<compile_context>
chip_gen: v6e
topology: v6e:2x2x1
jax: 0.10.0
libtpu: 0.0.40
codegen_flags: <defaults>
</compile_context>

<pallas_src>
import math
import functools

import jax
import jax.numpy as jnp
from jax.experimental import pallas as pl
from jax.experimental.pallas import tpu as pltpu


# ---------------------------------------------------------------------------
# Kernels
# ---------------------------------------------------------------------------
def _pe_add_kernel(x_ref, pe_ref, o_ref):
    # x_ref: (tS, B, D), pe_ref: (tS, D) — broadcast pe over the batch axis.
    o_ref[...] = x_ref[...] + pe_ref[...][:, None, :]


def _pe_add_dropout_kernel(x_ref, pe_ref, u_ref, o_ref, *, p):
    # Training mode: inverted dropout, keep iff u >= p, scale kept by 1/(1-p).
    y = x_ref[...] + pe_ref[...][:, None, :]
    keep = u_ref[...] >= jnp.asarray(p, u_ref.dtype)
    scale = jnp.asarray(1.0 / (1.0 - p), y.dtype)
    o_ref[...] = jnp.where(keep, y * scale, jnp.zeros_like(y))


# ---------------------------------------------------------------------------
# Parameter (buffer) construction — deterministic, mirrors torch __init__
# ---------------------------------------------------------------------------
def make_positional_encoding(d_model: int, max_len: int = 5000) -> jnp.ndarray:
    position = jnp.arange(max_len, dtype=jnp.float32)[:, None]          # (max_len, 1)
    div_term = jnp.exp(
        jnp.arange(0, d_model, 2, dtype=jnp.float32)
        * (-math.log(10000.0) / d_model)
    )                                                                    # (d_model//2,)
    angles = position * div_term                                         # (max_len, d_model//2)
    pe = jnp.zeros((max_len, d_model), dtype=jnp.float32)
    pe = pe.at[:, 0::2].set(jnp.sin(angles))
    pe = pe.at[:, 1::2].set(jnp.cos(angles))
    return pe                                                            # (max_len, d_model)


# ---------------------------------------------------------------------------
# Tiling helper
# ---------------------------------------------------------------------------
def _choose_seq_tile(S: int, B: int, D: int, itemsize: int,
                     target_block_bytes: int = 4 * 1024 * 1024) -> int:
    """Largest S-tile with ~target-sized blocks; multiple of 8 or the full S
    (keeps the pe block's sublane dim legal and blocks VMEM-friendly on v7x)."""
    rows = max(1, target_block_bytes // (B * D * itemsize))
    if rows >= S:
        return S
    return max(8, (rows // 8) * 8)


# ---------------------------------------------------------------------------
# Wrapper
# ---------------------------------------------------------------------------
def positional_encoding_forward(
    x: jnp.ndarray,
    pe: jnp.ndarray,
    *,
    p: float = 0.1,
    training: bool = False,
    rng_key=None,
) -> jnp.ndarray:
    """x: (S, B, D). pe: (max_len, D). Returns (S, B, D)."""
    S, B, D = x.shape
    itemsize = x.dtype.itemsize
    pe_slice = pe[:S].astype(x.dtype)      # cast once in XLA, not per grid step

    tS = _choose_seq_tile(S, B, D, itemsize)
    grid = (pl.cdiv(S, tS),)

    x_spec = pl.BlockSpec((tS, B, D), lambda i: (i, 0, 0))
    pe_spec = pl.BlockSpec((tS, D), lambda i: (i, 0))
    out_spec = pl.BlockSpec((tS, B, D), lambda i: (i, 0, 0))

    block_bytes = tS * B * D * itemsize
    pe_bytes = tS * D * itemsize

    if not training or p == 0.0:
        # x, out double-buffered + pe double-buffered, plus headroom.
        need = 2 * (2 * block_bytes + pe_bytes)
        vmem_limit = int(min(max(need + (8 << 20), 16 << 20), 64 << 20))
        return pl.pallas_call(
            _pe_add_kernel,
            out_shape=jax.ShapeDtypeStruct((S, B, D), x.dtype),
            grid_spec=pl.GridSpec(
                grid=grid,
                in_specs=[x_spec, pe_spec],
                out_specs=out_spec,
            ),
            input_output_aliases={0: 0},   # pure elementwise update of x
            compiler_params=pltpu.CompilerParams(
                dimension_semantics=("parallel",),
                vmem_limit_bytes=vmem_limit,
            ),
            cost_estimate=pl.CostEstimate(
                flops=S * B * D,
                transcendentals=0,
                bytes_accessed=(2 * S * B * D + S * D) * itemsize,
            ),
        )(x, pe_slice)

    # Training mode: uniforms generated in plain JAX (portable; see TODO above).
    if rng_key is None:
        rng_key = jax.random.PRNGKey(0)
    u = jax.random.uniform(rng_key, (S, B, D), dtype=jnp.float32)
    u_spec = pl.BlockSpec((tS, B, D), lambda i: (i, 0, 0))
    u_block_bytes = tS * B * D * u.dtype.itemsize

    need = 2 * (2 * block_bytes + u_block_bytes + pe_bytes)
    vmem_limit = int(min(max(need + (8 << 20), 16 << 20), 64 << 20))

    kernel = functools.partial(_pe_add_dropout_kernel, p=float(p))
    return pl.pallas_call(
        kernel,
        out_shape=jax.ShapeDtypeStruct((S, B, D), x.dtype),
        grid_spec=pl.GridSpec(
            grid=grid,
            in_specs=[x_spec, pe_spec, u_spec],
            out_specs=out_spec,
        ),
        input_output_aliases={0: 0},
        compiler_params=pltpu.CompilerParams(
            dimension_semantics=("parallel",),
            vmem_limit_bytes=vmem_limit,
        ),
        cost_estimate=pl.CostEstimate(
            flops=3 * S * B * D,
            transcendentals=0,
            bytes_accessed=(2 * S * B * D + S * D) * itemsize
                           + S * B * D * u.dtype.itemsize,
        ),
    )(x, pe_slice, u)


# ---------------------------------------------------------------------------
# Main
# ---------------------------------------------------------------------------
if __name__ == "__main__":
    d_model = 32
    seq_len = 8
    batch = 2
    max_len = 64
    p = 0.1

    key = jax.random.PRNGKey(0)
    x_key, drop_key = jax.random.split(key)
    x = jax.random.normal(x_key, (seq_len, batch, d_model), dtype=jnp.float32)

    pe = make_positional_encoding(d_model, max_len)

    # Pure-JAX references (computed up front).
    ref_eval = x + pe[:seq_len][:, None, :]

    # Eval mode (dropout = identity) — matches PyTorch module.eval().
    out = positional_encoding_forward(x, pe, p=p, training=False)
    out = jax.block_until_ready(out)
    assert out.shape == (seq_len, batch, d_model)
    assert jnp.allclose(out, ref_eval, atol=1e-6), "eval-mode mismatch vs reference"

    # Training mode (inverted dropout with wrapper-generated uniforms).
    out_train = positional_encoding_forward(x, pe, p=p, training=True, rng_key=drop_key)
    out_train = jax.block_until_ready(out_train)
    u = jax.random.uniform(drop_key, (seq_len, batch, d_model), dtype=jnp.float32)
    ref_train = jnp.where(u >= p, ref_eval * (1.0 / (1.0 - p)), 0.0)
    assert out_train.shape == (seq_len, batch, d_model)
    assert jnp.allclose(out_train, ref_train, atol=1e-5), "train-mode mismatch vs reference"

    print("KERNEL_OK")
</pallas_src>

<mosaic_0001>
module attributes {stable_mosaic.version = 11 : i64} {
  func.func @_pe_add_kernel(%arg0: i32, %arg1: memref<8x2x32xf32, #tpu.memory_space<vmem>>, %arg2: memref<8x32xf32, #tpu.memory_space<vmem>>, %arg3: memref<8x2x32xf32, #tpu.memory_space<vmem>>) attributes {dimension_semantics = [#tpu.dimension_semantics<parallel>], iteration_bounds = array<i64: 1>, scalar_prefetch = 0 : i64, scratch_operands = 0 : i64, tpu.core_type = #tpu.core_type<tc>, window_params = [{transform_indices = @transform_0, window_bounds = array<i64: 8, 2, 32>}, {transform_indices = @transform_1, window_bounds = array<i64: 8, 32>}, {transform_indices = @transform_2, window_bounds = array<i64: 8, 2, 32>}]} {
    %c0 = arith.constant 0 : index
    %c0_0 = arith.constant 0 : index
    %c0_1 = arith.constant 0 : index
    %0 = vector.load %arg1[%c0, %c0_0, %c0_1] : memref<8x2x32xf32, #tpu.memory_space<vmem>>, vector<8x2x32xf32>
    %c0_2 = arith.constant 0 : index
    %c0_3 = arith.constant 0 : index
    %1 = vector.load %arg2[%c0_2, %c0_3] : memref<8x32xf32, #tpu.memory_space<vmem>>, vector<8x32xf32>
    %2 = vector.shape_cast %1 : vector<8x32xf32> to vector<8x1x32xf32>
    %3 = vector.broadcast %2 : vector<8x1x32xf32> to vector<8x2x32xf32>
    %4 = arith.addf %0, %3 : vector<8x2x32xf32>
    %c0_4 = arith.constant 0 : index
    %c0_5 = arith.constant 0 : index
    %c0_6 = arith.constant 0 : index
    %5 = vector.load %arg3[%c0_4, %c0_5, %c0_6] : memref<8x2x32xf32, #tpu.memory_space<vmem>>, vector<8x2x32xf32>
    tpu.vector_store %arg3[%c0_4, %c0_5, %c0_6], %4 {strides = array<i32>} : memref<8x2x32xf32, #tpu.memory_space<vmem>>, vector<8x2x32xf32>,
    return
  }
  func.func @transform_0(%arg0: i32) -> (i32, i32, i32) {
    %c0_i32 = arith.constant 0 : i32
    %c0_i32_0 = arith.constant 0 : i32
    %c0_i32_1 = arith.constant 0 : i32
    return %arg0, %c0_i32, %c0_i32_0 : i32, i32, i32
  }
  func.func @transform_1(%arg0: i32) -> (i32, i32) {
    %c0_i32 = arith.constant 0 : i32
    %c0_i32_0 = arith.constant 0 : i32
    return %arg0, %c0_i32 : i32, i32
  }
  func.func @transform_2(%arg0: i32) -> (i32, i32, i32) {
    %c0_i32 = arith.constant 0 : i32
    %c0_i32_0 = arith.constant 0 : i32
    %c0_i32_1 = arith.constant 0 : i32
    return %arg0, %c0_i32, %c0_i32_0 : i32, i32, i32
  }
}

</mosaic_0001>

<bundles_post_ra>
// kernel: tpu_custom_call.1
= control target key start
LH: loop header
LB: loop body
LE: loop exit
PB: predicated region body
PF: predicated region fallthrough
CT: control target
= control target key end

     0   :  { %7 = vsyncpa [#allocation3], 0  ;;  %s251_s0 = inlined_call_operand.hbm [shape: f32[8,2,32], index: 0, kind: input, shape index: {}, may-alias: {0,2}]   ;;  %s252_s1 = inlined_call_operand.vmem [shape: f32[8,32], index: 1, kind: input, shape index: {}]   ;;  %s253_s2 = inlined_call_operand.hbm [shape: f32[8,2,32], index: 2, kind: output, shape index: {}, may-alias: {0,2}]  }
   0x1   :  { %8 = vsyncpa [#allocation4], 0  ;;  %s208_s9 = smov [#allocation2]  }
   0x2   :  { %s14_s10 = sshll.u32 %s208_s9, 4  ;;  %s15_s10 = int_to_ptr.vmem [resolvable:$true] %s14_s10 }
   0x3   :  { %s172_s11 = scalar_lea.vmem %s15_s10, 256  ;;  %p177_p1 = scmp.lt.s32.totalorder %s15_s10, %s15_s10 }
   0x4   :  { %p173_p0 = scmp.ne.s32.totalorder %s15_s10, %s172_s11  ;;  %p178_p2 = scmp.lt.s32.totalorder %s172_s11, %s172_s11 }
   0x6   :  { %p179_p3 = por %p178_p2, %p177_p1 }
   0x8   :  { %p180_p4 = pnand %p179_p3, %p173_p0 }
   0xa   :  { %183 = shalt.err (!%p180_p4)
}
   0xb   :  { %s209_s12 = smov 32   ;;  %s210_s13 = smov 2  }
   0xc   :  { %20 = dma.hbm_to_vmem [thread:$0]  %s251_s0, 256, %s15_s10, [#allocation3], %s209_s12, %s209_s12, %s210_s13  }
   0xd   :  { %204 = dma.done.wait [#allocation3], 256  }
   0xe   :  { %205 = vsyncadd [#allocation3], 4294967040  ;;  %v40_v0 = vlaneseq  ;;  %v211_v1 = vmov 1966171168   ;;  %v34_v6 = vld [vmem:[%s252_s1] sm:$0xff]  ;;  %vm133_vm0 = vcmask 254976  }
   0xf   :  { %v38_v2 = vunpack.c.l.s4 %v211_v1  ;;  %v36_v9 = vcombine.high %v34_v6, %v34_v6  ;;  %v26_v13 = vld [vmem:[#allocation2] sm:$0x3]  ;;  %v27_v18 = vld [vmem:[#allocation2 + $0x2] sm:$0x3]  ;;  %v28_v19 = vld [vmem:[#allocation2 + $0x4] sm:$0x3] }
  0x10   :  { %v41_v3 = vshrl.u32 %v40_v0, 7  ;;  %v30_v25 = vld [vmem:[#allocation2 + $0x8] sm:$0x3]  ;;  %v29_v26 = vld [vmem:[#allocation2 + $0x6] sm:$0x3]  ;;  %s212_s0 = smov [#allocation5]  }
  0x11   :  { %v39_v4 = vunpack.c.0.s8 %v38_v2  ;;  %v31_v33 = vld [vmem:[#allocation2 + $0xa] sm:$0x3]  ;;  %v32_v34 = vld [vmem:[#allocation2 + $0xc] sm:$0x3]  ;;  %v33_v40 = vld [vmem:[#allocation2 + $0xe] sm:$0x3] }
  0x12   :  { %v87_v8 = vsub.s32 0, %v41_v3  ;;  %s147_s1 = sshll.u32 %s212_s0, 4  ;;  %s148_s1 = int_to_ptr.vmem [resolvable:$true] %s147_s1 }
  0x13   :  { %v42_v5 = vsub.s32 %v39_v4, %v41_v3  ;;  %s184_s18 = scalar_lea.vmem %s148_s1, 256  ;;  %p189_p6 = scmp.lt.s32.totalorder %s148_s1, %s148_s1 }
  0x14   :  { %p185_p5 = scmp.ne.s32.totalorder %s148_s1, %s184_s18  ;;  %p190_p7 = scmp.lt.s32.totalorder %s184_s18, %s184_s18 }
  0x15   :  { %v43_v7 = vrot.slane %v34_v6, %v42_v5  ;;  %v50_v12 = vrot.slane %v36_v9, %v42_v5 }
  0x16   :  { %p191_p8 = por %p190_p7, %p189_p6 }
  0x17   :  { %v59_v10 = vrot.slane %v43_v7, %v42_v5  ;;  %v51_v11 = vcombine.high %v43_v7, %v43_v7  ;;  %v66_v17 = vrot.slane %v50_v12, %v42_v5  ;;  %v52_v20 = vcombine.high %v50_v12, %v50_v12 }
  0x18   :  { %p192_p9 = pnand %p191_p8, %p185_p5 }
  0x19   :  { %v88_v14 = vrot.slane %v59_v10, %v87_v8  ;;  %v73_v15 = vrot.slane %v51_v11, %v42_v5  ;;  %v81_v16 = vcombine.high %v59_v10, %v59_v10  ;;  %v104_v27 = vrot.slane %v66_v17, %v87_v8 }
  0x1a   :  { %v80_v28 = vrot.slane %v52_v20, %v42_v5  ;;  %v82_v29 = vcombine.high %v66_v17, %v66_v17 }
  0x1b   :  { %v125_v21 = vadd.f32 %v88_v14, %v26_v13  ;;  %v92_v22 = vrot.slane %v73_v15, %v87_v8  ;;  %v96_v23 = vrot.slane %v81_v16, %v87_v8  ;;  %v83_v24 = vcombine.high %v73_v15, %v73_v15 }
  0x1c   :  { %v129_v35 = vadd.f32 %v104_v27, %v30_v25  ;;  %v108_v36 = vrot.slane %v80_v28, %v87_v8  ;;  %v112_v37 = vrot.slane %v82_v29, %v87_v8  ;;  %v84_v38 = vcombine.high %v80_v28, %v80_v28 }
  0x1d   :  { %134 = vst.msk [vmem:[#allocation5] sm:$0x3] %vm133_vm0, %v125_v21  ;;  %v126_v30 = vadd.f32 %v92_v22, %v27_v18  ;;  %v127_v31 = vadd.f32 %v96_v23, %v28_v19  ;;  %v100_v32 = vrot.slane %v83_v24, %v87_v8 }
  0x1e   :  { %138 = vst.msk [vmem:[#allocation5 + $0x8] sm:$0x3] %vm133_vm0, %v129_v35  ;;  %v130_v41 = vadd.f32 %v108_v36, %v31_v33  ;;  %v131_v42 = vadd.f32 %v112_v37, %v32_v34  ;;  %v116_v43 = vrot.slane %v84_v38, %v87_v8 }
  0x1f   :  { %135 = vst.msk [vmem:[#allocation5 + $0x2] sm:$0x3] %vm133_vm0, %v126_v30  ;;  %136 = vst.msk [vmem:[#allocation5 + $0x4] sm:$0x3] %vm133_vm0, %v127_v31  ;;  %v128_v39 = vadd.f32 %v100_v32, %v29_v26 }
  0x20   :  { %139 = vst.msk [vmem:[#allocation5 + $0xa] sm:$0x3] %vm133_vm0, %v130_v41  ;;  %140 = vst.msk [vmem:[#allocation5 + $0xc] sm:$0x3] %vm133_vm0, %v131_v42  ;;  %v132_v44 = vadd.f32 %v116_v43, %v33_v40 }
  0x21   :  { %137 = vst.msk [vmem:[#allocation5 + $0x6] sm:$0x3] %vm133_vm0, %v128_v39 }
  0x22   :  { %141 = vst.msk [vmem:[#allocation5 + $0xe] sm:$0x3] %vm133_vm0, %v132_v44 }
  0x23   :  { %195 = shalt.err (!%p192_p9)
}
  0x24   :  { %153 = dma.vmem_to_hbm [thread:$0]  %s148_s1, 256, %s253_s2, [#allocation4], %s209_s12, %s209_s12, %s210_s13  }
  0x25   :  { %206 = dma.done.wait [#allocation4], 256  }
  0x26   :  { %207 = vsyncadd [#allocation4], 4294967040 }
  0x27   :  { %157 = vsyncpa [#allocation3], 1 }
  0x28   :  { %158 = vsyncpa [#allocation4], 1 }

</bundles_post_ra>
